<compile_context>
chip_gen: v5e
topology: v5e:2x2
jax: 0.10.0
libtpu: 0.0.40
codegen_flags: <defaults>
</compile_context>

<pallas_src>
import functools

import jax
import jax.numpy as jnp
from jax.experimental import pallas as pl
from jax.experimental.pallas import tpu as pltpu

NEG_SLOPE = 0.01   # nn.LeakyReLU default
SUBLANE = 8        # f32 sublane count


def _round_up(x, m):
    return (x + m - 1) // m * m


def _leaky_relu(x):
    # For 0 < slope < 1 this is identical to where(x>0, x, slope*x),
    # but is mul+max (2 VALU ops) instead of cmp+mul+select (3 ops).
    return jnp.maximum(x, NEG_SLOPE * x)


def dqn_mlp_kernel(x_ref,
                   w1_ref, b1_ref,
                   w2_ref, b2_ref,
                   w3_ref, b3_ref,
                   w4_ref, b4_ref,
                   o_ref,
                   *, matmul_dtype):
    # One tile_m-row slab of the batch. x and all weights already arrive in
    # matmul_dtype (pre-cast outside the kernel); only the intermediate
    # activations are re-cast before each matmul. Accumulation, bias add and
    # LeakyReLU stay f32.
    x = x_ref[...]

    h = jnp.dot(x, w1_ref[...], preferred_element_type=jnp.float32) + b1_ref[...]
    h = _leaky_relu(h)

    h = jnp.dot(h.astype(matmul_dtype), w2_ref[...],
                preferred_element_type=jnp.float32) + b2_ref[...]
    h = _leaky_relu(h)

    h = jnp.dot(h.astype(matmul_dtype), w3_ref[...],
                preferred_element_type=jnp.float32) + b3_ref[...]
    h = _leaky_relu(h)

    out = jnp.dot(h.astype(matmul_dtype), w4_ref[...],
                  preferred_element_type=jnp.float32) + b4_ref[...]
    o_ref[...] = out.astype(o_ref.dtype)


def prepare_params(params, matmul_dtype=jnp.bfloat16):
    """One-time parameter prep: cast weights to the MXU operand dtype.

    Biases stay f32 ([1, out]) since bias add / activation run in f32.
    """
    out = {}
    for i in range(1, 5):
        out[f"w{i}"] = params[f"w{i}"].astype(matmul_dtype)
        out[f"b{i}"] = params[f"b{i}"].astype(jnp.float32)
    return out


def dqn_forward(x, kparams, *, tile_m=1024):
    """x: [batch, state_dim] float32. kparams: output of prepare_params().

    tile_m: batch-tile size; rounded to a multiple of 8 and capped so the grid
            has >= 2 steps when the batch is big enough (lets the "parallel"
            batch axis actually shard across v7x's two TensorCores).
    """
    matmul_dtype = kparams["w1"].dtype
    batch, state_dim = x.shape
    hidden = kparams["w1"].shape[1]
    action_dim = kparams["w4"].shape[1]

    tile_m = max(SUBLANE, _round_up(tile_m, SUBLANE))
    batch_r = _round_up(batch, SUBLANE)
    if batch_r >= 2 * SUBLANE:
        # Guarantee >= 2 grid steps when there is enough work (v7x megacore).
        tile_m = min(tile_m, _round_up(pl.cdiv(batch_r, 2), SUBLANE))
    tile_m = min(tile_m, batch_r)
    padded_batch = _round_up(batch_r, tile_m)

    xp = x
    if padded_batch != batch:
        xp = jnp.pad(x, ((0, padded_batch - batch), (0, 0)))
    xp = xp.astype(matmul_dtype)   # halve streamed bytes; no in-kernel cast

    grid = (padded_batch // tile_m,)

    def resident(shape):
        # Full-shape block, constant block index -> stays VMEM-resident
        # across all grid iterations (fetched once, never re-DMA'd).
        return pl.BlockSpec(shape, lambda i: (0, 0))

    in_specs = [
        # x tile: last dim == full array dim, so (8,128) rule is satisfied
        # without lane padding.
        pl.BlockSpec((tile_m, state_dim), lambda i: (i, 0)),
        resident((state_dim, hidden)),   resident((1, hidden)),     # w1, b1
        resident((hidden, hidden)),      resident((1, hidden)),     # w2, b2
        resident((hidden, hidden)),      resident((1, hidden)),     # w3, b3
        resident((hidden, action_dim)),  resident((1, action_dim)), # w4, b4
    ]
    # Narrow output block (full action_dim last axis): avoids a 32x-inflated
    # writeback stream at the cost of masked stores on a 4-lane tail.
    out_spec = pl.BlockSpec((tile_m, action_dim), lambda i: (i, 0))

    kernel = functools.partial(dqn_mlp_kernel, matmul_dtype=matmul_dtype)

    out = pl.pallas_call(
        kernel,
        out_shape=jax.ShapeDtypeStruct((padded_batch, action_dim), jnp.float32),
        grid=grid,
        in_specs=in_specs,
        out_specs=out_spec,
        compiler_params=pltpu.CompilerParams(
            dimension_semantics=("parallel",),
            vmem_limit_bytes=32 * 1024 * 1024),
    )(xp,
      kparams["w1"], kparams["b1"],
      kparams["w2"], kparams["b2"],
      kparams["w3"], kparams["b3"],
      kparams["w4"], kparams["b4"])

    return out[:batch]


def init_params(key, state_dim, action_dim, hidden=128):
    """Deterministic init mimicking nn.Linear's U(-1/sqrt(fan_in), 1/sqrt(fan_in)).

    Weights are stored as [in, out] (already transposed for the kernel).
    """
    dims = [(state_dim, hidden), (hidden, hidden), (hidden, hidden),
            (hidden, action_dim)]
    params = {}
    for i, (fan_in, fan_out) in enumerate(dims, start=1):
        key, kw, kb = jax.random.split(key, 3)
        bound = 1.0 / (fan_in ** 0.5)
        params[f"w{i}"] = jax.random.uniform(
            kw, (fan_in, fan_out), jnp.float32, minval=-bound, maxval=bound)
        params[f"b{i}"] = jax.random.uniform(
            kb, (1, fan_out), jnp.float32, minval=-bound, maxval=bound)
    return params


def reference_forward(x, params, matmul_dtype=jnp.float32):
    """Plain-JAX reference mirroring the kernel's dtype semantics."""
    h = x.astype(matmul_dtype)
    for i in range(1, 4):
        h = jnp.dot(h, params[f"w{i}"].astype(matmul_dtype),
                    preferred_element_type=jnp.float32) + params[f"b{i}"]
        h = jnp.maximum(h, NEG_SLOPE * h)
        h = h.astype(matmul_dtype)
    return jnp.dot(h, params["w4"].astype(matmul_dtype),
                   preferred_element_type=jnp.float32) + params["b4"]


if __name__ == "__main__":
    STATE_DIM = 8
    ACTION_DIM = 4
    BATCH = 2

    key = jax.random.PRNGKey(0)
    key, kx = jax.random.split(key)
    x = jax.random.normal(kx, (BATCH, STATE_DIM), dtype=jnp.float32)

    params = init_params(key, STATE_DIM, ACTION_DIM)
    kparams = prepare_params(params, matmul_dtype=jnp.bfloat16)

    out = jax.block_until_ready(dqn_forward(x, kparams))
    assert out.shape == (BATCH, ACTION_DIM)

    # Check vs a reference using the same bf16-operand / f32-accumulate math.
    ref_bf16 = reference_forward(x, params, matmul_dtype=jnp.bfloat16)
    assert jnp.allclose(out, ref_bf16, atol=2e-2, rtol=2e-2), \
        "mismatch vs bf16-operand reference"

    # Sanity vs the pure-f32 module semantics (loose tolerance for bf16 ops).
    ref_f32 = reference_forward(x, params, matmul_dtype=jnp.float32)
    assert jnp.allclose(out, ref_f32, atol=1e-1, rtol=1e-1), \
        "mismatch vs f32 reference"

    print("KERNEL_OK")
</pallas_src>

<mosaic_0001>
module attributes {stable_mosaic.version = 11 : i64} {
  func.func @dqn_mlp_kernel(%arg0: i32, %arg1: memref<8x8xbf16, #tpu.memory_space<vmem>>, %arg2: memref<8x128xbf16, #tpu.memory_space<vmem>>, %arg3: memref<1x128xf32, #tpu.memory_space<vmem>>, %arg4: memref<128x128xbf16, #tpu.memory_space<vmem>>, %arg5: memref<1x128xf32, #tpu.memory_space<vmem>>, %arg6: memref<128x128xbf16, #tpu.memory_space<vmem>>, %arg7: memref<1x128xf32, #tpu.memory_space<vmem>>, %arg8: memref<128x4xbf16, #tpu.memory_space<vmem>>, %arg9: memref<1x4xf32, #tpu.memory_space<vmem>>, %arg10: memref<8x4xf32, #tpu.memory_space<vmem>>) attributes {dimension_semantics = [#tpu.dimension_semantics<parallel>], iteration_bounds = array<i64: 1>, scalar_prefetch = 0 : i64, scratch_operands = 0 : i64, tpu.core_type = #tpu.core_type<tc>, window_params = [{transform_indices = @transform_0, window_bounds = array<i64: 8, 8>}, {pipeline_mode = #tpu.pipeline_mode<synchronous>, transform_indices = @transform_1, window_bounds = array<i64: 8, 128>}, {pipeline_mode = #tpu.pipeline_mode<synchronous>, transform_indices = @transform_2, window_bounds = array<i64: 1, 128>}, {pipeline_mode = #tpu.pipeline_mode<synchronous>, transform_indices = @transform_3, window_bounds = array<i64: 128, 128>}, {pipeline_mode = #tpu.pipeline_mode<synchronous>, transform_indices = @transform_4, window_bounds = array<i64: 1, 128>}, {pipeline_mode = #tpu.pipeline_mode<synchronous>, transform_indices = @transform_5, window_bounds = array<i64: 128, 128>}, {pipeline_mode = #tpu.pipeline_mode<synchronous>, transform_indices = @transform_6, window_bounds = array<i64: 1, 128>}, {pipeline_mode = #tpu.pipeline_mode<synchronous>, transform_indices = @transform_7, window_bounds = array<i64: 128, 4>}, {pipeline_mode = #tpu.pipeline_mode<synchronous>, transform_indices = @transform_8, window_bounds = array<i64: 1, 4>}, {transform_indices = @transform_9, window_bounds = array<i64: 8, 4>}]} {
    %c0 = arith.constant 0 : index
    %c0_0 = arith.constant 0 : index
    %0 = vector.load %arg1[%c0, %c0_0] : memref<8x8xbf16, #tpu.memory_space<vmem>>, vector<8x8xbf16>
    %c0_1 = arith.constant 0 : index
    %c0_2 = arith.constant 0 : index
    %1 = vector.load %arg2[%c0_1, %c0_2] : memref<8x128xbf16, #tpu.memory_space<vmem>>, vector<8x128xbf16>
    %cst = arith.constant dense<0.000000e+00> : vector<8x128xf32>
    %2 = tpu.matmul %0, %1, %cst {dimension_numbers = #tpu.dot_dimension_numbers<[1], [0], [0], [1], [0, 0, 1, 1], [], []>} : vector<8x8xbf16>, vector<8x128xbf16>, vector<8x128xf32> -> vector<8x128xf32>
    %c0_3 = arith.constant 0 : index
    %c0_4 = arith.constant 0 : index
    %3 = vector.load %arg3[%c0_3, %c0_4] : memref<1x128xf32, #tpu.memory_space<vmem>>, vector<1x128xf32>
    %4 = vector.broadcast %3 : vector<1x128xf32> to vector<8x128xf32>
    %5 = arith.addf %2, %4 : vector<8x128xf32>
    %cst_5 = arith.constant 0.00999999977 : f32
    %6 = vector.broadcast %cst_5 : f32 to vector<8x128xf32>
    %7 = arith.mulf %6, %5 : vector<8x128xf32>
    %8 = arith.maximumf %5, %7 : vector<8x128xf32>
    %9 = arith.truncf %8 : vector<8x128xf32> to vector<8x128xbf16>
    %c0_6 = arith.constant 0 : index
    %c0_7 = arith.constant 0 : index
    %10 = vector.load %arg4[%c0_6, %c0_7] : memref<128x128xbf16, #tpu.memory_space<vmem>>, vector<128x128xbf16>
    %cst_8 = arith.constant dense<0.000000e+00> : vector<8x128xf32>
    %11 = tpu.matmul %9, %10, %cst_8 {dimension_numbers = #tpu.dot_dimension_numbers<[1], [0], [0], [1], [0, 0, 1, 1], [], []>} : vector<8x128xbf16>, vector<128x128xbf16>, vector<8x128xf32> -> vector<8x128xf32>
    %c0_9 = arith.constant 0 : index
    %c0_10 = arith.constant 0 : index
    %12 = vector.load %arg5[%c0_9, %c0_10] : memref<1x128xf32, #tpu.memory_space<vmem>>, vector<1x128xf32>
    %13 = vector.broadcast %12 : vector<1x128xf32> to vector<8x128xf32>
    %14 = arith.addf %11, %13 : vector<8x128xf32>
    %cst_11 = arith.constant 0.00999999977 : f32
    %15 = vector.broadcast %cst_11 : f32 to vector<8x128xf32>
    %16 = arith.mulf %15, %14 : vector<8x128xf32>
    %17 = arith.maximumf %14, %16 : vector<8x128xf32>
    %18 = arith.truncf %17 : vector<8x128xf32> to vector<8x128xbf16>
    %c0_12 = arith.constant 0 : index
    %c0_13 = arith.constant 0 : index
    %19 = vector.load %arg6[%c0_12, %c0_13] : memref<128x128xbf16, #tpu.memory_space<vmem>>, vector<128x128xbf16>
    %cst_14 = arith.constant dense<0.000000e+00> : vector<8x128xf32>
    %20 = tpu.matmul %18, %19, %cst_14 {dimension_numbers = #tpu.dot_dimension_numbers<[1], [0], [0], [1], [0, 0, 1, 1], [], []>} : vector<8x128xbf16>, vector<128x128xbf16>, vector<8x128xf32> -> vector<8x128xf32>
    %c0_15 = arith.constant 0 : index
    %c0_16 = arith.constant 0 : index
    %21 = vector.load %arg7[%c0_15, %c0_16] : memref<1x128xf32, #tpu.memory_space<vmem>>, vector<1x128xf32>
    %22 = vector.broadcast %21 : vector<1x128xf32> to vector<8x128xf32>
    %23 = arith.addf %20, %22 : vector<8x128xf32>
    %cst_17 = arith.constant 0.00999999977 : f32
    %24 = vector.broadcast %cst_17 : f32 to vector<8x128xf32>
    %25 = arith.mulf %24, %23 : vector<8x128xf32>
    %26 = arith.maximumf %23, %25 : vector<8x128xf32>
    %27 = arith.truncf %26 : vector<8x128xf32> to vector<8x128xbf16>
    %c0_18 = arith.constant 0 : index
    %c0_19 = arith.constant 0 : index
    %28 = vector.load %arg8[%c0_18, %c0_19] : memref<128x4xbf16, #tpu.memory_space<vmem>>, vector<128x4xbf16>
    %cst_20 = arith.constant dense<0.000000e+00> : vector<8x4xf32>
    %29 = tpu.matmul %27, %28, %cst_20 {dimension_numbers = #tpu.dot_dimension_numbers<[1], [0], [0], [1], [0, 0, 1, 1], [], []>} : vector<8x128xbf16>, vector<128x4xbf16>, vector<8x4xf32> -> vector<8x4xf32>
    %c0_21 = arith.constant 0 : index
    %c0_22 = arith.constant 0 : index
    %30 = vector.load %arg9[%c0_21, %c0_22] : memref<1x4xf32, #tpu.memory_space<vmem>>, vector<1x4xf32>
    %31 = vector.broadcast %30 : vector<1x4xf32> to vector<8x4xf32>
    %32 = arith.addf %29, %31 : vector<8x4xf32>
    %c0_23 = arith.constant 0 : index
    %c0_24 = arith.constant 0 : index
    %33 = vector.load %arg10[%c0_23, %c0_24] : memref<8x4xf32, #tpu.memory_space<vmem>>, vector<8x4xf32>
    tpu.vector_store %arg10[%c0_23, %c0_24], %32 {strides = array<i32>} : memref<8x4xf32, #tpu.memory_space<vmem>>, vector<8x4xf32>,
    return
  }
  func.func @transform_0(%arg0: i32) -> (i32, i32) {
    %c0_i32 = arith.constant 0 : i32
    %c0_i32_0 = arith.constant 0 : i32
    return %arg0, %c0_i32 : i32, i32
  }
  func.func @transform_1(%arg0: i32) -> (i32, i32) {
    %c0_i32 = arith.constant 0 : i32
    %c0_i32_0 = arith.constant 0 : i32
    %c0_i32_1 = arith.constant 0 : i32
    return %c0_i32, %c0_i32_0 : i32, i32
  }
  func.func @transform_2(%arg0: i32) -> (i32, i32) {
    %c0_i32 = arith.constant 0 : i32
    %c0_i32_0 = arith.constant 0 : i32
    %c0_i32_1 = arith.constant 0 : i32
    return %c0_i32, %c0_i32_0 : i32, i32
  }
  func.func @transform_3(%arg0: i32) -> (i32, i32) {
    %c0_i32 = arith.constant 0 : i32
    %c0_i32_0 = arith.constant 0 : i32
    %c0_i32_1 = arith.constant 0 : i32
    return %c0_i32, %c0_i32_0 : i32, i32
  }
  func.func @transform_4(%arg0: i32) -> (i32, i32) {
    %c0_i32 = arith.constant 0 : i32
    %c0_i32_0 = arith.constant 0 : i32
    %c0_i32_1 = arith.constant 0 : i32
    return %c0_i32, %c0_i32_0 : i32, i32
  }
  func.func @transform_5(%arg0: i32) -> (i32, i32) {
    %c0_i32 = arith.constant 0 : i32
    %c0_i32_0 = arith.constant 0 : i32
    %c0_i32_1 = arith.constant 0 : i32
    return %c0_i32, %c0_i32_0 : i32, i32
  }
  func.func @transform_6(%arg0: i32) -> (i32, i32) {
    %c0_i32 = arith.constant 0 : i32
    %c0_i32_0 = arith.constant 0 : i32
    %c0_i32_1 = arith.constant 0 : i32
    return %c0_i32, %c0_i32_0 : i32, i32
  }
  func.func @transform_7(%arg0: i32) -> (i32, i32) {
    %c0_i32 = arith.constant 0 : i32
    %c0_i32_0 = arith.constant 0 : i32
    %c0_i32_1 = arith.constant 0 : i32
    return %c0_i32, %c0_i32_0 : i32, i32
  }
  func.func @transform_8(%arg0: i32) -> (i32, i32) {
    %c0_i32 = arith.constant 0 : i32
    %c0_i32_0 = arith.constant 0 : i32
    %c0_i32_1 = arith.constant 0 : i32
    return %c0_i32, %c0_i32_0 : i32, i32
  }
  func.func @transform_9(%arg0: i32) -> (i32, i32) {
    %c0_i32 = arith.constant 0 : i32
    %c0_i32_0 = arith.constant 0 : i32
    return %arg0, %c0_i32 : i32, i32
  }
}

</mosaic_0001>

<bundles_post_ra>
// kernel: tpu_custom_call.1
= control target key start
LH: loop header
LB: loop body
LE: loop exit
PB: predicated region body
PF: predicated region fallthrough
CT: control target
= control target key end

     0   :  { %14 = vsyncpa [#allocation3], 0  ;;  %s696_s0 = inlined_call_operand.hbm [shape: bf16[8,8], index: 0, kind: input, shape index: {}]   ;;  %s697_s1 = inlined_call_operand.hbm [shape: bf16[8,128], index: 1, kind: input, shape index: {}]   ;;  %s698_s2 = inlined_call_operand.vmem [shape: f32[1,128], index: 2, kind: input, shape index: {}]   ;;  %s699_s3 = inlined_call_operand.vmem [shape: bf16[128,128], index: 3, kind: input, shape index: {}]   ;;  %s700_s4 = inlined_call_operand.vmem [shape: f32[1,128], index: 4, kind: input, shape index: {}]   ;;  %s701_s5 = inlined_call_operand.hbm [shape: bf16[128,128], index: 5, kind: input, shape index: {}]   ;;  %s702_s6 = inlined_call_operand.vmem [shape: f32[1,128], index: 6, kind: input, shape index: {}]   ;;  %s703_s7 = inlined_call_operand.vmem [shape: bf16[128,4], index: 7, kind: input, shape index: {}]   ;;  %s704_s8 = inlined_call_operand.vmem [shape: f32[1,4], index: 8, kind: input, shape index: {}]   ;;  %s705_s9 = inlined_call_operand.vmem [shape: f32[8,4], index: 9, kind: output, shape index: {}]  }
   0x1   :  { %15 = vsyncpa [#allocation5], 0  ;;  %s32_s11 = sshll.u32 %s697_s1, 4  ;;  %s569_s12 = smov [#allocation4]   ;;  %s33_s11 = int_to_ptr.hbm [resolvable:$true] %s32_s11 }
   0x2   :  { %s34_s13 = sshll.u32 %s569_s12, 4  ;;  %s21_s16 = sshll.u32 %s696_s0, 4  ;;  %s35_s13 = int_to_ptr.vmem [resolvable:$true] %s34_s13  ;;  %s22_s16 = int_to_ptr.hbm [resolvable:$true] %s21_s16 }
   0x3   :  { %37 = dma.hbm_to_vmem [thread:$0]  %s33_s11, 64, %s35_s13, [#allocation5]  }
   0x4   :  { %s570_s17 = smov [#allocation2]   ;;  %s48_s21 = sshll.u32 %s701_s5, 4  ;;  %s49_s21 = int_to_ptr.hbm [resolvable:$true] %s48_s21 }
   0x5   :  { %s23_s18 = sshll.u32 %s570_s17, 4  ;;  %s571_s1 = smov [#allocation6]   ;;  %s24_s18 = int_to_ptr.vmem [resolvable:$true] %s23_s18 }
   0x6   :  { %26 = dma.hbm_to_vmem [thread:$0]  %s22_s16, 64, %s24_s18, [#allocation3]  }
   0x7   :  { %s50_s22 = sshll.u32 %s571_s1, 4  ;;  %s572_s23 = smov 64   ;;  %s51_s22 = int_to_ptr.vmem [resolvable:$true] %s50_s22 }
   0x8   :  { %s573_s24 = smov 4  }
   0x9   :  { %56 = dma.hbm_to_vmem [thread:$0]  %s49_s21, 1024, %s51_s22, [#allocation5], %s572_s23, %s572_s23, %s573_s24  }
   0xa   :  { %565 = dma.done.wait [#allocation3], 64  }
   0xb   :  { %566 = vsyncadd [#allocation3], 4294967232 }
   0xc   :  { %567 = dma.done.wait [#allocation5], 1088  }
   0xd   :  { %568 = vsyncadd [#allocation5], 4294966208  ;;  %vm86_vm0 = vcmask 1043456   ;;  %v77_v0 = vld [vmem:[#allocation4] sm:$0xf]  ;;  %v467_v1 = vld [vmem:[%s699_s3 + $0x38] sm:$0xff] }
   0xe   :  { %v88_v2 = vsel %vm86_vm0, %v77_v0, 0  ;;  %v76_v3 = vld [vmem:[#allocation2] sm:$0xf]  ;;  %vm82_vm1 = vcmask 64512   ;;  %174 = vmatpush.bf16.msra.mxu1 %v467_v1  ;;  %v466_v4 = vld [vmem:[%s699_s3 + $0x30] sm:$0xff]  ;;  %v465_v5 = vld [vmem:[%s699_s3 + $0x28] sm:$0xff] }
   0xf   :  { %97 = vmatpush.bf16.msra.mxu0 %v88_v2  ;;  %v464_v6 = vld [vmem:[%s699_s3 + $0x20] sm:$0xff]  ;;  %v463_v7 = vld [vmem:[%s699_s3 + $0x18] sm:$0xff]  ;;  %v462_v8 = vld [vmem:[%s699_s3 + $0x10] sm:$0xff]  ;;  %vm355_vm2 = vcmask 31744  }
  0x10   :  { %v461_v9 = vld [vmem:[%s699_s3 + $0x8] sm:$0xff]  ;;  %v460_v10 = vld [vmem:[%s699_s3] sm:$0xff]  ;;  %v474_v12 = vld [vmem:[#allocation6 + $0x30] sm:$0xff] }
  0x11   :  { %v475_v11 = vld [vmem:[#allocation6 + $0x38] sm:$0xff]  ;;  %v473_v13 = vld [vmem:[#allocation6 + $0x28] sm:$0xff]  ;;  %v472_v14 = vld [vmem:[#allocation6 + $0x20] sm:$0xff] }
  0x12   :  { %363 = vmatmul.msk.bf16.vlgmr.msra.gmra.mxu0 %vm82_vm1, %v76_v3  ;;  %175 = vmatpush.bf16.msra.mxu1 %v466_v4  ;;  %v471_v15 = vld [vmem:[#allocation6 + $0x18] sm:$0xff]  ;;  %v470_v16 = vld [vmem:[#allocation6 + $0x10] sm:$0xff]  ;;  %v469_v24 = vld [vmem:[#allocation6 + $0x8] sm:$0xff] }
  0x13   :  { %258 = vmatpush.bf16.msra.mxu2 %v475_v11  ;;  %v489_v17 = vld [vmem:[%s698_s2] ss:$0 sm:$0xff]  ;;  %v468_v25 = vld [vmem:[#allocation6] sm:$0xff]  ;;  %v483_v26 = vld [vmem:[%s703_s7 + $0x38] sm:$0xff] }
  0x14   :  { %342 = vmatpush.bf16.msra.mxu3 %v483_v26  ;;  %v482_v27 = vld [vmem:[%s703_s7 + $0x30] sm:$0xff]  ;;  %v481_v28 = vld [vmem:[%s703_s7 + $0x28] sm:$0xff]  ;;  %v480_v29 = vld [vmem:[%s703_s7 + $0x20] sm:$0xff] }
  0x15   :  { %v479_v30 = vld [vmem:[%s703_s7 + $0x18] sm:$0xff]  ;;  %v478_v31 = vld [vmem:[%s703_s7 + $0x10] sm:$0xff]  ;;  %v490_v32 = vld [vmem:[%s700_s4] ss:$0 sm:$0xff] }
  0x16   :  { %176 = vmatpush.bf16.msra.mxu1 %v465_v5  ;;  %v477_v39 = vld [vmem:[%s703_s7 + $0x8] sm:$0xff]  ;;  %v476_v40 = vld [vmem:[%s703_s7] sm:$0xff] }
  0x17   :  { %259 = vmatpush.bf16.msra.mxu2 %v474_v12  ;;  %v491_v41 = vld [vmem:[%s702_s6] ss:$0 sm:$0xff] }
  0x18   :  { %343 = vmatpush.bf16.msra.mxu3 %v482_v27  ;;  %v492_v48 = vld [vmem:[%s704_s8] ss:$0 sm:$0xff] }
  0x1a   :  { %177 = vmatpush.bf16.msra.mxu1 %v464_v6 }
  0x1b   :  { %260 = vmatpush.bf16.msra.mxu2 %v473_v13 }
  0x1c   :  { %344 = vmatpush.bf16.msra.mxu3 %v481_v28 }
  0x1e   :  { %178 = vmatpush.bf16.msra.mxu1 %v463_v7 }
  0x1f   :  { %261 = vmatpush.bf16.msra.mxu2 %v472_v14 }
  0x20   :  { %345 = vmatpush.bf16.msra.mxu3 %v480_v29 }
  0x22   :  { %179 = vmatpush.bf16.msra.mxu1 %v462_v8 }
  0x23   :  { %262 = vmatpush.bf16.msra.mxu2 %v471_v15 }
  0x24   :  { %346 = vmatpush.bf16.msra.mxu3 %v479_v30 }
  0x26   :  { %180 = vmatpush.bf16.msra.mxu1 %v461_v9 }
  0x27   :  { %263 = vmatpush.bf16.msra.mxu2 %v470_v16 }
  0x28   :  { %347 = vmatpush.bf16.msra.mxu3 %v478_v31 }
  0x2a   :  { %181 = vmatpush.bf16.msra.mxu1 %v460_v10 }
  0x2b   :  { %264 = vmatpush.bf16.msra.mxu2 %v469_v24 }
  0x2c   :  { %348 = vmatpush.bf16.msra.mxu3 %v477_v39 }
  0x2f   :  { %265 = vmatpush.bf16.msra.mxu2 %v468_v25 }
  0x30   :  { %349 = vmatpush.bf16.msra.mxu3 %v476_v40 }
  0x8f   :  { %v99_v18 = vpop.f32.mrf.mxu0 }
  0x90   :  { %v100_v19 = vadd.f32 %v489_v17, %v99_v18 }
  0x92   :  { %v103_v20 = vmul.f32 0.01, %v100_v19 }
  0x94   :  { %v104_v21 = vmax.f32 %v100_v19, %v103_v20 }
  0x96   :  { %v105_v22 = vpack.c.bf16 %v104_v21, %v104_v21 }
  0x97   :  { %v101_v23 = vpop.f32.mrf.mxu0 }
  0x98   :  { %182 = vmatmul.bf16.vlgmr.msra.gmra.mxu1 %v105_v22 }
 0x115   :  { %v183_v33 = vpop.f32.mrf.mxu1 }
 0x116   :  { %v184_v34 = vadd.f32 %v490_v32, %v183_v33 }
 0x118   :  { %v187_v35 = vmul.f32 0.01, %v184_v34 }
 0x11a   :  { %v188_v36 = vmax.f32 %v184_v34, %v187_v35 }
 0x11c   :  { %v189_v37 = vpack.c.bf16 %v188_v36, %v188_v36 }
 0x11d   :  { %v185_v38 = vpop.f32.mrf.mxu1 }
 0x11e   :  { %266 = vmatmul.bf16.vlgmr.msra.gmra.mxu2 %v189_v37 }
 0x1a1   :  { %v267_v42 = vpop.f32.mrf.mxu2 }
 0x1a2   :  { %v268_v43 = vadd.f32 %v491_v41, %v267_v42 }
 0x1a4   :  { %v271_v44 = vmul.f32 0.01, %v268_v43 }
 0x1a6   :  { %v272_v45 = vmax.f32 %v268_v43, %v271_v44 }
 0x1a8   :  { %v273_v46 = vpack.c.bf16 %v272_v45, %v272_v45 }
 0x1a9   :  { %v269_v47 = vpop.f32.mrf.mxu2 }
 0x1aa   :  { %350 = vmatmul.bf16.vlgmr.msra.gmra.mxu3 %v273_v46 }
 0x22d   :  { %v351_v49 = vpop.f32.mrf.mxu3 }
 0x22e   :  { %v352_v50 = vadd.f32 %v492_v48, %v351_v49 }
 0x230   :  { %356 = vst.msk [vmem:[%s705_s9] sm:$0xff] %vm355_vm2, %v352_v50 }
 0x235   :  { %v353_v51 = vpop.f32.mrf.mxu3 }
 0x236   :  { %361 = vsyncpa [#allocation3], 1 }
 0x237   :  { %362 = vsyncpa [#allocation5], 1 }

</bundles_post_ra>
